<compile_context>
chip_gen: v7x
topology: tpu7x:2x2x1
jax: 0.10.0
libtpu: 0.0.40
codegen_flags: <defaults>
</compile_context>

<pallas_src>
import functools

import jax
import jax.numpy as jnp
from jax.experimental import pallas as pl
from jax.experimental.pallas import tpu as pltpu


def flen_kernel(x_ref, w1_ref, fo_bias_ref, r_mf_ref, r_fm_ref,
                wf1_ref, bf1_ref, wf2_ref, bf2_ref,
                wo_s_ref, wo_bi_ref, wo_dnn_ref, bo_ref, o_ref):
    x = x_ref[...]                                     # (F, P, D, TB), f32
    F, P, D, TB = x.shape

    # field embeddings: sum of per-field feature embeddings
    field_emb = jnp.sum(x, axis=1)                     # (F, D, TB)

    # ---- first-order term y_S: sublane reduce over a lane-dense (C, TB) ----
    y_S = jnp.sum(w1_ref[...], axis=0, keepdims=True) + fo_bias_ref[...]   # (1, TB)

    # ---- MF part: pairwise field crosses weighted by r_mf ----
    # Static unroll over the F*(F-1)/2 pairs; each iteration is a full-vreg
    # (D, TB) multiply-add, so the VPU cost is negligible in this layout.
    r_mf = r_mf_ref[...]                               # (num_pairs, 1)
    y_MF = jnp.zeros((D, TB), jnp.float32)
    k = 0
    for i in range(F - 1):
        for j in range(i + 1, F):
            y_MF = y_MF + r_mf[k:k + 1, :] * (field_emb[i] * field_emb[j])
            k += 1                                     # (D, TB)

    # ---- FM part: per-field bi-interaction weighted by r_fm ----
    sum_of_sq = jnp.sum(x * x, axis=1)                 # (F, D, TB)
    fwbi = 0.5 * (field_emb * field_emb - sum_of_sq)   # (F, D, TB)
    y_FM = jnp.sum(fwbi * r_fm_ref[...][:, :, None], axis=0)   # (D, TB)

    fwBI = y_MF + y_FM                                 # (D, TB)

    # ---- DNN part ----
    # (F, D, TB) -> (F*D, TB): merges leading dims into whole sublane tiles
    # (D == 8), so no cross-tile relayout is required.
    fc_in = field_emb.reshape(F * D, TB)               # (F*D, TB)
    # Weights are passed pre-transposed as (out, in): batch fills MXU's N axis.
    h = jnp.dot(wf1_ref[...], fc_in, preferred_element_type=jnp.float32) + bf1_ref[...]
    h = jnp.maximum(h, 0.0)
    h = jnp.dot(wf2_ref[...], h, preferred_element_type=jnp.float32) + bf2_ref[...]
    h = jnp.maximum(h, 0.0)                            # (fc_out, TB)

    # ---- output layer: split the (1+D+fc_out, 1) weight into the three
    # concat segments and accumulate partial logits (no concat, no N=1 matmul).
    logit = (wo_s_ref[...] * y_S
             + jnp.sum(fwBI * wo_bi_ref[...], axis=0, keepdims=True)
             + jnp.sum(h * wo_dnn_ref[...], axis=0, keepdims=True)
             + bo_ref[...])                            # (1, TB), lane-dense
    o_ref[...] = jax.nn.sigmoid(logit)


@functools.partial(jax.jit, static_argnums=(2, 3, 4))
def flen_forward(feat_index, params, num_fields, per_field, tile_b=None):
    emb_dim = params["emb_table"].shape[1]
    B, C = feat_index.shape
    F, P, D = num_fields, per_field, emb_dim
    num_pairs = F * (F - 1) // 2
    fc1_out = params["w_fc1"].shape[1]
    fc2_out = params["w_fc2"].shape[1]

    # ---- JAX-side glue: embedding gathers + batch-on-lanes layout ----
    # Gather with transposed indices so only the minor (B, D) pair needs
    # transposing afterwards (B stays the fast-varying axis in the result).
    idx_t = feat_index.T                               # (C, B)
    emb_t = params["emb_table"][idx_t]                 # (C, B, D)
    feat_emb_t = jnp.transpose(emb_t, (0, 2, 1)).astype(jnp.float32)   # (C, D, B)
    feat_emb_t = feat_emb_t.reshape(F, P, D, B)        # leading-dim split, free
    w1_t = params["fo_table"][idx_t, 0].astype(jnp.float32)            # (C, B)

    # Batch tile on the lane axis; pad B up to a multiple of the tile.
    # VMEM per tile is tiny (~0.4 KB/sample), so prefer big tiles to amortize
    # per-grid-step overhead and keep the output store fully lane-dense.
    if tile_b is None:
        TB = max(128, min(2048, pl.next_power_of_2(B)))
    else:
        TB = tile_b
    n_tiles = pl.cdiv(B, TB)
    B_pad = n_tiles * TB
    pad = B_pad - B
    if pad:
        feat_emb_t = jnp.pad(feat_emb_t, ((0, 0), (0, 0), (0, 0), (0, pad)))
        w1_t = jnp.pad(w1_t, ((0, 0), (0, pad)))

    # Small dense parameters, reshaped for the transposed layout.
    wf1_t = params["w_fc1"].T                          # (fc1_out, F*D)
    wf2_t = params["w_fc2"].T                          # (fc2_out, fc1_out)
    bf1_t = params["b_fc1"].reshape(-1, 1)             # (fc1_out, 1)
    bf2_t = params["b_fc2"].reshape(-1, 1)             # (fc2_out, 1)
    fo_bias = params["fo_bias"].reshape(1, 1)
    r_mf = params["r_mf"]                              # (num_pairs, 1)
    r_fm = params["r_fm"]                              # (F, 1)
    w_out = params["w_out"]                            # (1 + D + fc2_out, 1)
    wo_s = w_out[0:1, :]                               # (1, 1)   -> y_S
    wo_bi = w_out[1:1 + D, :]                          # (D, 1)   -> fwBI
    wo_dnn = w_out[1 + D:, :]                          # (fc2_out, 1) -> y_dnn
    bo = params["b_out"].reshape(1, 1)

    def const2(i):
        return (0, 0)

    in_specs = [
        pl.BlockSpec((F, P, D, TB), lambda i: (0, 0, 0, i)),   # feat_emb tile
        pl.BlockSpec((C, TB), lambda i: (0, i)),               # first-order w
        pl.BlockSpec((1, 1), const2),                          # fo_bias
        pl.BlockSpec((num_pairs, 1), const2),                  # r_mf
        pl.BlockSpec((F, 1), const2),                          # r_fm
        pl.BlockSpec((fc1_out, F * D), const2),                # wf1^T
        pl.BlockSpec((fc1_out, 1), const2),                    # bf1
        pl.BlockSpec((fc2_out, fc1_out), const2),              # wf2^T
        pl.BlockSpec((fc2_out, 1), const2),                    # bf2
        pl.BlockSpec((1, 1), const2),                          # wo_s
        pl.BlockSpec((D, 1), const2),                          # wo_bi
        pl.BlockSpec((fc2_out, 1), const2),                    # wo_dnn
        pl.BlockSpec((1, 1), const2),                          # bo
    ]
    out_specs = pl.BlockSpec((1, TB), lambda i: (0, i))        # lane-dense logits

    # Rough cost hint so XLA schedules the surrounding gather/transpose well.
    flops = B_pad * (2 * F * D * fc1_out + 2 * fc1_out * fc2_out
                     + 16 * F * P * D + 3 * num_pairs * D)
    bytes_accessed = 4 * (feat_emb_t.size + w1_t.size + B_pad) + 16 * 1024
    cost = pl.CostEstimate(flops=flops, transcendentals=B_pad,
                           bytes_accessed=bytes_accessed)

    out = pl.pallas_call(
        flen_kernel,
        out_shape=jax.ShapeDtypeStruct((1, B_pad), jnp.float32),
        grid=(n_tiles,),
        in_specs=in_specs,
        out_specs=out_specs,
        compiler_params=pltpu.CompilerParams(
            dimension_semantics=("parallel",),
            vmem_limit_bytes=32 * 1024 * 1024),
        cost_estimate=cost,
    )(feat_emb_t, w1_t, fo_bias, r_mf, r_fm,
      wf1_t, bf1_t, wf2_t, bf2_t, wo_s, wo_bi, wo_dnn, bo)

    return out[:, :B].T                                # (B, 1)


def flen_reference(feat_index, params, num_fields, per_field):
    # Pure-JAX mirror of the PyTorch forward, for correctness checking.
    emb = params["emb_table"][feat_index]
    B, C, D = emb.shape
    x = emb.reshape(B, num_fields, per_field, D)
    field_emb = x.sum(axis=2)
    y_S = params["fo_table"][feat_index, 0].sum(axis=1, keepdims=True) + params["fo_bias"]
    rows, cols = [], []
    for i in range(num_fields - 1):
        for j in range(i + 1, num_fields):
            rows.append(i)
            cols.append(j)
    p = field_emb[:, jnp.array(rows)]
    q = field_emb[:, jnp.array(cols)]
    y_MF = (p * q * params["r_mf"][None]).sum(axis=1)
    fwbi = 0.5 * (field_emb ** 2 - (x ** 2).sum(axis=2))
    y_FM = (fwbi * params["r_fm"][None]).sum(axis=1)
    fc_in = field_emb.reshape(B, num_fields * D)
    h = jax.nn.relu(fc_in @ params["w_fc1"] + params["b_fc1"])
    h = jax.nn.relu(h @ params["w_fc2"] + params["b_fc2"])
    feats = jnp.concatenate([y_S, y_MF + y_FM, h], axis=1)
    return jax.nn.sigmoid(feats @ params["w_out"] + params["b_out"])


def xavier_uniform(key, shape):
    fan_in = shape[0]
    fan_out = shape[1] if len(shape) > 1 else 1
    limit = (6.0 / (fan_in + fan_out)) ** 0.5
    return jax.random.uniform(key, shape, jnp.float32, -limit, limit)


if __name__ == "__main__":
    # Small configuration consistent with the module:
    #   emb_dim=8, num_fields=4, per_field=3 -> num_categories=12,
    #   num_feats=64 (vocab), fc_dims=[32, 32, 32] (so F*D = 32 = fc_dims[0]).
    B = 2
    emb_dim = 8
    num_fields = 4
    per_field = 3
    num_categories = num_fields * per_field      # 12
    num_feats = 64
    fc_dims = [32, 32, 32]
    num_pairs = num_fields * (num_fields - 1) // 2
    out_in_dim = fc_dims[-1] + 1 + emb_dim       # 41

    key = jax.random.PRNGKey(0)
    ks = jax.random.split(key, 12)

    params = {
        "emb_table": xavier_uniform(ks[0], (num_feats, emb_dim)),
        "fo_table":  xavier_uniform(ks[1], (num_categories, 1)),
        "fo_bias":   jax.random.normal(ks[2], (1, 1), jnp.float32),
        "r_mf":      xavier_uniform(ks[3], (num_pairs, 1)),
        "r_fm":      xavier_uniform(ks[4], (num_fields, 1)),
        "w_fc1":     xavier_uniform(ks[5], (fc_dims[0], fc_dims[1])),
        "b_fc1":     jnp.zeros((1, fc_dims[1]), jnp.float32),
        "w_fc2":     xavier_uniform(ks[6], (fc_dims[1], fc_dims[2])),
        "b_fc2":     jnp.zeros((1, fc_dims[2]), jnp.float32),
        "w_out":     xavier_uniform(ks[7], (out_in_dim, 1)),
        "b_out":     jnp.zeros((1, 1), jnp.float32),
    }

    # Indices kept in [0, num_categories) so they are valid for BOTH embedding
    # tables (the reference module indexes first_order_weights, sized
    # num_categories, with the same feat_index).
    feat_index = jax.random.randint(ks[8], (B, num_categories), 0, num_categories)

    y = flen_forward(feat_index, params, num_fields, per_field)
    y = jax.block_until_ready(y)
    y_ref = flen_reference(feat_index, params, num_fields, per_field)
    assert y.shape == (B, 1)
    assert jnp.allclose(y, y_ref, atol=1e-5, rtol=1e-5), (y, y_ref)

    # Second check: multi-tile grid + ragged batch (exercises the lane padding
    # and the "parallel" batch grid with tile_b=128 -> 3 tiles).
    B2 = 260
    feat_index2 = jax.random.randint(ks[9], (B2, num_categories), 0, num_categories)
    y2 = flen_forward(feat_index2, params, num_fields, per_field, 128)
    y2 = jax.block_until_ready(y2)
    y2_ref = flen_reference(feat_index2, params, num_fields, per_field)
    assert y2.shape == (B2, 1)
    assert jnp.allclose(y2, y2_ref, atol=1e-5, rtol=1e-5)

    print("KERNEL_OK")
</pallas_src>

<mosaic_0001>
module attributes {stable_mosaic.version = 11 : i64} {
  func.func @flen_kernel(%arg0: i32, %arg1: memref<4x3x8x128xf32, #tpu.memory_space<vmem>>, %arg2: memref<12x128xf32, #tpu.memory_space<vmem>>, %arg3: memref<1x1xf32, #tpu.memory_space<vmem>>, %arg4: memref<6x1xf32, #tpu.memory_space<vmem>>, %arg5: memref<4x1xf32, #tpu.memory_space<vmem>>, %arg6: memref<32x32xf32, #tpu.memory_space<vmem>>, %arg7: memref<32x1xf32, #tpu.memory_space<vmem>>, %arg8: memref<32x32xf32, #tpu.memory_space<vmem>>, %arg9: memref<32x1xf32, #tpu.memory_space<vmem>>, %arg10: memref<1x1xf32, #tpu.memory_space<vmem>>, %arg11: memref<8x1xf32, #tpu.memory_space<vmem>>, %arg12: memref<32x1xf32, #tpu.memory_space<vmem>>, %arg13: memref<1x1xf32, #tpu.memory_space<vmem>>, %arg14: memref<1x128xf32, #tpu.memory_space<vmem>>) attributes {dimension_semantics = [#tpu.dimension_semantics<parallel>], iteration_bounds = array<i64: 1>, scalar_prefetch = 0 : i64, scratch_operands = 0 : i64, tpu.core_type = #tpu.core_type<tc>, window_params = [{transform_indices = @transform_0, window_bounds = array<i64: 4, 3, 8, 128>}, {transform_indices = @transform_1, window_bounds = array<i64: 12, 128>}, {pipeline_mode = #tpu.pipeline_mode<synchronous>, transform_indices = @transform_2, window_bounds = array<i64: 1, 1>}, {pipeline_mode = #tpu.pipeline_mode<synchronous>, transform_indices = @transform_3, window_bounds = array<i64: 6, 1>}, {pipeline_mode = #tpu.pipeline_mode<synchronous>, transform_indices = @transform_4, window_bounds = array<i64: 4, 1>}, {pipeline_mode = #tpu.pipeline_mode<synchronous>, transform_indices = @transform_5, window_bounds = array<i64: 32, 32>}, {pipeline_mode = #tpu.pipeline_mode<synchronous>, transform_indices = @transform_6, window_bounds = array<i64: 32, 1>}, {pipeline_mode = #tpu.pipeline_mode<synchronous>, transform_indices = @transform_7, window_bounds = array<i64: 32, 32>}, {pipeline_mode = #tpu.pipeline_mode<synchronous>, transform_indices = @transform_8, window_bounds = array<i64: 32, 1>}, {pipeline_mode = #tpu.pipeline_mode<synchronous>, transform_indices = @transform_9, window_bounds = array<i64: 1, 1>}, {pipeline_mode = #tpu.pipeline_mode<synchronous>, transform_indices = @transform_10, window_bounds = array<i64: 8, 1>}, {pipeline_mode = #tpu.pipeline_mode<synchronous>, transform_indices = @transform_11, window_bounds = array<i64: 32, 1>}, {pipeline_mode = #tpu.pipeline_mode<synchronous>, transform_indices = @transform_12, window_bounds = array<i64: 1, 1>}, {transform_indices = @transform_13, window_bounds = array<i64: 1, 128>}]} {
    %c0 = arith.constant 0 : index
    %c0_0 = arith.constant 0 : index
    %c0_1 = arith.constant 0 : index
    %c0_2 = arith.constant 0 : index
    %0 = vector.load %arg1[%c0, %c0_0, %c0_1, %c0_2] : memref<4x3x8x128xf32, #tpu.memory_space<vmem>>, vector<4x3x8x128xf32>
    %cst = arith.constant dense<0.000000e+00> : vector<4x8x128xf32>
    %1 = vector.multi_reduction <add>, %0, %cst [1] : vector<4x3x8x128xf32> to vector<4x8x128xf32>
    %c0_3 = arith.constant 0 : index
    %c0_4 = arith.constant 0 : index
    %2 = vector.load %arg2[%c0_3, %c0_4] : memref<12x128xf32, #tpu.memory_space<vmem>>, vector<12x128xf32>
    %cst_5 = arith.constant dense<0.000000e+00> : vector<128xf32>
    %3 = vector.multi_reduction <add>, %2, %cst_5 [0] : vector<12x128xf32> to vector<128xf32>
    %4 = vector.shape_cast %3 : vector<128xf32> to vector<1x128xf32>
    %c0_6 = arith.constant 0 : index
    %c0_7 = arith.constant 0 : index
    %5 = vector.load %arg3[%c0_6, %c0_7] : memref<1x1xf32, #tpu.memory_space<vmem>>, vector<1x1xf32>
    %6 = vector.broadcast %5 : vector<1x1xf32> to vector<1x128xf32>
    %7 = arith.addf %4, %6 : vector<1x128xf32>
    %c0_8 = arith.constant 0 : index
    %c0_9 = arith.constant 0 : index
    %8 = vector.load %arg4[%c0_8, %c0_9] : memref<6x1xf32, #tpu.memory_space<vmem>>, vector<6x1xf32>
    %cst_10 = arith.constant 0.000000e+00 : f32
    %9 = vector.broadcast %cst_10 : f32 to vector<8x128xf32>
    %10 = vector.extract_strided_slice %8 {offsets = [0, 0], sizes = [1, 1], strides = [1, 1]} : vector<6x1xf32> to vector<1x1xf32>
    %11 = vector.extract_strided_slice %1 {offsets = [0, 0, 0], sizes = [1, 8, 128], strides = [1, 1, 1]} : vector<4x8x128xf32> to vector<1x8x128xf32>
    %12 = vector.shape_cast %11 : vector<1x8x128xf32> to vector<8x128xf32>
    %13 = vector.extract_strided_slice %1 {offsets = [1, 0, 0], sizes = [1, 8, 128], strides = [1, 1, 1]} : vector<4x8x128xf32> to vector<1x8x128xf32>
    %14 = vector.shape_cast %13 : vector<1x8x128xf32> to vector<8x128xf32>
    %15 = arith.mulf %12, %14 : vector<8x128xf32>
    %16 = vector.broadcast %10 : vector<1x1xf32> to vector<8x128xf32>
    %17 = arith.mulf %16, %15 : vector<8x128xf32>
    %18 = arith.addf %9, %17 : vector<8x128xf32>
    %19 = vector.extract_strided_slice %8 {offsets = [1, 0], sizes = [1, 1], strides = [1, 1]} : vector<6x1xf32> to vector<1x1xf32>
    %20 = vector.extract_strided_slice %1 {offsets = [0, 0, 0], sizes = [1, 8, 128], strides = [1, 1, 1]} : vector<4x8x128xf32> to vector<1x8x128xf32>
    %21 = vector.shape_cast %20 : vector<1x8x128xf32> to vector<8x128xf32>
    %22 = vector.extract_strided_slice %1 {offsets = [2, 0, 0], sizes = [1, 8, 128], strides = [1, 1, 1]} : vector<4x8x128xf32> to vector<1x8x128xf32>
    %23 = vector.shape_cast %22 : vector<1x8x128xf32> to vector<8x128xf32>
    %24 = arith.mulf %21, %23 : vector<8x128xf32>
    %25 = vector.broadcast %19 : vector<1x1xf32> to vector<8x128xf32>
    %26 = arith.mulf %25, %24 : vector<8x128xf32>
    %27 = arith.addf %18, %26 : vector<8x128xf32>
    %28 = vector.extract_strided_slice %8 {offsets = [2, 0], sizes = [1, 1], strides = [1, 1]} : vector<6x1xf32> to vector<1x1xf32>
    %29 = vector.extract_strided_slice %1 {offsets = [0, 0, 0], sizes = [1, 8, 128], strides = [1, 1, 1]} : vector<4x8x128xf32> to vector<1x8x128xf32>
    %30 = vector.shape_cast %29 : vector<1x8x128xf32> to vector<8x128xf32>
    %31 = vector.extract_strided_slice %1 {offsets = [3, 0, 0], sizes = [1, 8, 128], strides = [1, 1, 1]} : vector<4x8x128xf32> to vector<1x8x128xf32>
    %32 = vector.shape_cast %31 : vector<1x8x128xf32> to vector<8x128xf32>
    %33 = arith.mulf %30, %32 : vector<8x128xf32>
    %34 = vector.broadcast %28 : vector<1x1xf32> to vector<8x128xf32>
    %35 = arith.mulf %34, %33 : vector<8x128xf32>
    %36 = arith.addf %27, %35 : vector<8x128xf32>
    %37 = vector.extract_strided_slice %8 {offsets = [3, 0], sizes = [1, 1], strides = [1, 1]} : vector<6x1xf32> to vector<1x1xf32>
    %38 = vector.extract_strided_slice %1 {offsets = [1, 0, 0], sizes = [1, 8, 128], strides = [1, 1, 1]} : vector<4x8x128xf32> to vector<1x8x128xf32>
    %39 = vector.shape_cast %38 : vector<1x8x128xf32> to vector<8x128xf32>
    %40 = vector.extract_strided_slice %1 {offsets = [2, 0, 0], sizes = [1, 8, 128], strides = [1, 1, 1]} : vector<4x8x128xf32> to vector<1x8x128xf32>
    %41 = vector.shape_cast %40 : vector<1x8x128xf32> to vector<8x128xf32>
    %42 = arith.mulf %39, %41 : vector<8x128xf32>
    %43 = vector.broadcast %37 : vector<1x1xf32> to vector<8x128xf32>
    %44 = arith.mulf %43, %42 : vector<8x128xf32>
    %45 = arith.addf %36, %44 : vector<8x128xf32>
    %46 = vector.extract_strided_slice %8 {offsets = [4, 0], sizes = [1, 1], strides = [1, 1]} : vector<6x1xf32> to vector<1x1xf32>
    %47 = vector.extract_strided_slice %1 {offsets = [1, 0, 0], sizes = [1, 8, 128], strides = [1, 1, 1]} : vector<4x8x128xf32> to vector<1x8x128xf32>
    %48 = vector.shape_cast %47 : vector<1x8x128xf32> to vector<8x128xf32>
    %49 = vector.extract_strided_slice %1 {offsets = [3, 0, 0], sizes = [1, 8, 128], strides = [1, 1, 1]} : vector<4x8x128xf32> to vector<1x8x128xf32>
    %50 = vector.shape_cast %49 : vector<1x8x128xf32> to vector<8x128xf32>
    %51 = arith.mulf %48, %50 : vector<8x128xf32>
    %52 = vector.broadcast %46 : vector<1x1xf32> to vector<8x128xf32>
    %53 = arith.mulf %52, %51 : vector<8x128xf32>
    %54 = arith.addf %45, %53 : vector<8x128xf32>
    %55 = vector.extract_strided_slice %8 {offsets = [5, 0], sizes = [1, 1], strides = [1, 1]} : vector<6x1xf32> to vector<1x1xf32>
    %56 = vector.extract_strided_slice %1 {offsets = [2, 0, 0], sizes = [1, 8, 128], strides = [1, 1, 1]} : vector<4x8x128xf32> to vector<1x8x128xf32>
    %57 = vector.shape_cast %56 : vector<1x8x128xf32> to vector<8x128xf32>
    %58 = vector.extract_strided_slice %1 {offsets = [3, 0, 0], sizes = [1, 8, 128], strides = [1, 1, 1]} : vector<4x8x128xf32> to vector<1x8x128xf32>
    %59 = vector.shape_cast %58 : vector<1x8x128xf32> to vector<8x128xf32>
    %60 = arith.mulf %57, %59 : vector<8x128xf32>
    %61 = vector.broadcast %55 : vector<1x1xf32> to vector<8x128xf32>
    %62 = arith.mulf %61, %60 : vector<8x128xf32>
    %63 = arith.addf %54, %62 : vector<8x128xf32>
    %64 = arith.mulf %0, %0 : vector<4x3x8x128xf32>
    %cst_11 = arith.constant dense<0.000000e+00> : vector<4x8x128xf32>
    %65 = vector.multi_reduction <add>, %64, %cst_11 [1] : vector<4x3x8x128xf32> to vector<4x8x128xf32>
    %66 = arith.mulf %1, %1 : vector<4x8x128xf32>
    %67 = arith.subf %66, %65 : vector<4x8x128xf32>
    %cst_12 = arith.constant 5.000000e-01 : f32
    %68 = vector.broadcast %cst_12 : f32 to vector<4x8x128xf32>
    %69 = arith.mulf %68, %67 : vector<4x8x128xf32>
    %c0_13 = arith.constant 0 : index
    %c0_14 = arith.constant 0 : index
    %70 = vector.load %arg5[%c0_13, %c0_14] : memref<4x1xf32, #tpu.memory_space<vmem>>, vector<4x1xf32>
    %71 = vector.shape_cast %70 : vector<4x1xf32> to vector<4x1x1xf32>
    %72 = vector.broadcast %71 : vector<4x1x1xf32> to vector<4x8x128xf32>
    %73 = arith.mulf %69, %72 : vector<4x8x128xf32>
    %cst_15 = arith.constant dense<0.000000e+00> : vector<8x128xf32>
    %74 = vector.multi_reduction <add>, %73, %cst_15 [0] : vector<4x8x128xf32> to vector<8x128xf32>
    %75 = arith.addf %63, %74 : vector<8x128xf32>
    %76 = vector.shape_cast %1 : vector<4x8x128xf32> to vector<32x128xf32>
    %c0_16 = arith.constant 0 : index
    %c0_17 = arith.constant 0 : index
    %77 = vector.load %arg6[%c0_16, %c0_17] : memref<32x32xf32, #tpu.memory_space<vmem>>, vector<32x32xf32>
    %cst_18 = arith.constant dense<0.000000e+00> : vector<32x128xf32>
    %78 = tpu.matmul %77, %76, %cst_18 {dimension_numbers = #tpu.dot_dimension_numbers<[1], [0], [0], [1], [0, 0, 1, 1], [], []>} : vector<32x32xf32>, vector<32x128xf32>, vector<32x128xf32> -> vector<32x128xf32>
    %c0_19 = arith.constant 0 : index
    %c0_20 = arith.constant 0 : index
    %79 = vector.load %arg7[%c0_19, %c0_20] : memref<32x1xf32, #tpu.memory_space<vmem>>, vector<32x1xf32>
    %80 = vector.broadcast %79 : vector<32x1xf32> to vector<32x128xf32>
    %81 = arith.addf %78, %80 : vector<32x128xf32>
    %cst_21 = arith.constant 0.000000e+00 : f32
    %82 = vector.broadcast %cst_21 : f32 to vector<32x128xf32>
    %83 = arith.maximumf %81, %82 : vector<32x128xf32>
    %c0_22 = arith.constant 0 : index
    %c0_23 = arith.constant 0 : index
    %84 = vector.load %arg8[%c0_22, %c0_23] : memref<32x32xf32, #tpu.memory_space<vmem>>, vector<32x32xf32>
    %cst_24 = arith.constant dense<0.000000e+00> : vector<32x128xf32>
    %85 = tpu.matmul %84, %83, %cst_24 {dimension_numbers = #tpu.dot_dimension_numbers<[1], [0], [0], [1], [0, 0, 1, 1], [], []>} : vector<32x32xf32>, vector<32x128xf32>, vector<32x128xf32> -> vector<32x128xf32>
    %c0_25 = arith.constant 0 : index
    %c0_26 = arith.constant 0 : index
    %86 = vector.load %arg9[%c0_25, %c0_26] : memref<32x1xf32, #tpu.memory_space<vmem>>, vector<32x1xf32>
    %87 = vector.broadcast %86 : vector<32x1xf32> to vector<32x128xf32>
    %88 = arith.addf %85, %87 : vector<32x128xf32>
    %cst_27 = arith.constant 0.000000e+00 : f32
    %89 = vector.broadcast %cst_27 : f32 to vector<32x128xf32>
    %90 = arith.maximumf %88, %89 : vector<32x128xf32>
    %c0_28 = arith.constant 0 : index
    %c0_29 = arith.constant 0 : index
    %91 = vector.load %arg10[%c0_28, %c0_29] : memref<1x1xf32, #tpu.memory_space<vmem>>, vector<1x1xf32>
    %92 = vector.broadcast %91 : vector<1x1xf32> to vector<1x128xf32>
    %93 = arith.mulf %92, %7 : vector<1x128xf32>
    %c0_30 = arith.constant 0 : index
    %c0_31 = arith.constant 0 : index
    %94 = vector.load %arg11[%c0_30, %c0_31] : memref<8x1xf32, #tpu.memory_space<vmem>>, vector<8x1xf32>
    %95 = vector.broadcast %94 : vector<8x1xf32> to vector<8x128xf32>
    %96 = arith.mulf %75, %95 : vector<8x128xf32>
    %cst_32 = arith.constant dense<0.000000e+00> : vector<128xf32>
    %97 = vector.multi_reduction <add>, %96, %cst_32 [0] : vector<8x128xf32> to vector<128xf32>
    %98 = vector.shape_cast %97 : vector<128xf32> to vector<1x128xf32>
    %99 = arith.addf %93, %98 : vector<1x128xf32>
    %c0_33 = arith.constant 0 : index
    %c0_34 = arith.constant 0 : index
    %100 = vector.load %arg12[%c0_33, %c0_34] : memref<32x1xf32, #tpu.memory_space<vmem>>, vector<32x1xf32>
    %101 = vector.broadcast %100 : vector<32x1xf32> to vector<32x128xf32>
    %102 = arith.mulf %90, %101 : vector<32x128xf32>
    %cst_35 = arith.constant dense<0.000000e+00> : vector<128xf32>
    %103 = vector.multi_reduction <add>, %102, %cst_35 [0] : vector<32x128xf32> to vector<128xf32>
    %104 = vector.shape_cast %103 : vector<128xf32> to vector<1x128xf32>
    %105 = arith.addf %99, %104 : vector<1x128xf32>
    %c0_36 = arith.constant 0 : index
    %c0_37 = arith.constant 0 : index
    %106 = vector.load %arg13[%c0_36, %c0_37] : memref<1x1xf32, #tpu.memory_space<vmem>>, vector<1x1xf32>
    %107 = vector.broadcast %106 : vector<1x1xf32> to vector<1x128xf32>
    %108 = arith.addf %105, %107 : vector<1x128xf32>
    %109 = arith.negf %108 : vector<1x128xf32>
    %110 = math.exp %109 : vector<1x128xf32>
    %cst_38 = arith.constant 1.000000e+00 : f32
    %111 = vector.broadcast %cst_38 : f32 to vector<1x128xf32>
    %112 = arith.addf %111, %110 : vector<1x128xf32>
    %113 = arith.divf %111, %112 : vector<1x128xf32>
    %c0_39 = arith.constant 0 : index
    %c0_40 = arith.constant 0 : index
    %114 = vector.load %arg14[%c0_39, %c0_40] : memref<1x128xf32, #tpu.memory_space<vmem>>, vector<1x128xf32>
    tpu.vector_store %arg14[%c0_39, %c0_40], %113 {strides = array<i32>} : memref<1x128xf32, #tpu.memory_space<vmem>>, vector<1x128xf32>,
    return
  }
  func.func @transform_0(%arg0: i32) -> (i32, i32, i32, i32) {
    %c0_i32 = arith.constant 0 : i32
    %c0_i32_0 = arith.constant 0 : i32
    %c0_i32_1 = arith.constant 0 : i32
    %c0_i32_2 = arith.constant 0 : i32
    return %c0_i32, %c0_i32_0, %c0_i32_1, %arg0 : i32, i32, i32, i32
  }
  func.func @transform_1(%arg0: i32) -> (i32, i32) {
    %c0_i32 = arith.constant 0 : i32
    %c0_i32_0 = arith.constant 0 : i32
    return %c0_i32, %arg0 : i32, i32
  }
  func.func @transform_2(%arg0: i32) -> (i32, i32) {
    %c0_i32 = arith.constant 0 : i32
    %c0_i32_0 = arith.constant 0 : i32
    %c0_i32_1 = arith.constant 0 : i32
    return %c0_i32, %c0_i32_0 : i32, i32
  }
  func.func @transform_3(%arg0: i32) -> (i32, i32) {
    %c0_i32 = arith.constant 0 : i32
    %c0_i32_0 = arith.constant 0 : i32
    %c0_i32_1 = arith.constant 0 : i32
    return %c0_i32, %c0_i32_0 : i32, i32
  }
  func.func @transform_4(%arg0: i32) -> (i32, i32) {
    %c0_i32 = arith.constant 0 : i32
    %c0_i32_0 = arith.constant 0 : i32
    %c0_i32_1 = arith.constant 0 : i32
    return %c0_i32, %c0_i32_0 : i32, i32
  }
  func.func @transform_5(%arg0: i32) -> (i32, i32) {
    %c0_i32 = arith.constant 0 : i32
    %c0_i32_0 = arith.constant 0 : i32
    %c0_i32_1 = arith.constant 0 : i32
    return %c0_i32, %c0_i32_0 : i32, i32
  }
  func.func @transform_6(%arg0: i32) -> (i32, i32) {
    %c0_i32 = arith.constant 0 : i32
    %c0_i32_0 = arith.constant 0 : i32
    %c0_i32_1 = arith.constant 0 : i32
    return %c0_i32, %c0_i32_0 : i32, i32
  }
  func.func @transform_7(%arg0: i32) -> (i32, i32) {
    %c0_i32 = arith.constant 0 : i32
    %c0_i32_0 = arith.constant 0 : i32
    %c0_i32_1 = arith.constant 0 : i32
    return %c0_i32, %c0_i32_0 : i32, i32
  }
  func.func @transform_8(%arg0: i32) -> (i32, i32) {
    %c0_i32 = arith.constant 0 : i32
    %c0_i32_0 = arith.constant 0 : i32
    %c0_i32_1 = arith.constant 0 : i32
    return %c0_i32, %c0_i32_0 : i32, i32
  }
  func.func @transform_9(%arg0: i32) -> (i32, i32) {
    %c0_i32 = arith.constant 0 : i32
    %c0_i32_0 = arith.constant 0 : i32
    %c0_i32_1 = arith.constant 0 : i32
    return %c0_i32, %c0_i32_0 : i32, i32
  }
  func.func @transform_10(%arg0: i32) -> (i32, i32) {
    %c0_i32 = arith.constant 0 : i32
    %c0_i32_0 = arith.constant 0 : i32
    %c0_i32_1 = arith.constant 0 : i32
    return %c0_i32, %c0_i32_0 : i32, i32
  }
  func.func @transform_11(%arg0: i32) -> (i32, i32) {
    %c0_i32 = arith.constant 0 : i32
    %c0_i32_0 = arith.constant 0 : i32
    %c0_i32_1 = arith.constant 0 : i32
    return %c0_i32, %c0_i32_0 : i32, i32
  }
  func.func @transform_12(%arg0: i32) -> (i32, i32) {
    %c0_i32 = arith.constant 0 : i32
    %c0_i32_0 = arith.constant 0 : i32
    %c0_i32_1 = arith.constant 0 : i32
    return %c0_i32, %c0_i32_0 : i32, i32
  }
  func.func @transform_13(%arg0: i32) -> (i32, i32) {
    %c0_i32 = arith.constant 0 : i32
    %c0_i32_0 = arith.constant 0 : i32
    return %c0_i32, %arg0 : i32, i32
  }
}

</mosaic_0001>

<bundles_post_ra>
// kernel: flen_forward.1
= control target key start
LH: loop header
LB: loop body
LE: loop exit
PB: predicated region body
PF: predicated region fallthrough
CT: control target
= control target key end

     0   :  { %v87_v0 = vlaneseq  ;;  %v667_v4 = vmov 0   ;;  %v668_v5 = vmov 1966171168   ;;  %vm261_vm0 = vcmask 261120   ;;  %s998_s0 = inlined_call_operand.vmem [shape: f32[4,3,8,128], index: 0, kind: input, shape index: {}]   ;;  %s999_s2 = inlined_call_operand.<no memory space> [shape: f32[1,1], index: 2, kind: input, shape index: {}]   ;;  %s1000_s9 = inlined_call_operand.<no memory space> [shape: f32[1,1], index: 9, kind: input, shape index: {}]   ;;  %s1001_s12 = inlined_call_operand.<no memory space> [shape: f32[1,1], index: 12, kind: input, shape index: {}]   ;;  %s1002_s5 = inlined_call_operand.vmem [shape: f32[32,32], index: 5, kind: input, shape index: {}]   ;;  %s1003_s6 = inlined_call_operand.vmem [shape: f32[32,1], index: 6, kind: input, shape index: {}]   ;;  %s1004_s4 = inlined_call_operand.vmem [shape: f32[4,1], index: 4, kind: input, shape index: {}]   ;;  %s1005_s3 = inlined_call_operand.vmem [shape: f32[6,1], index: 3, kind: input, shape index: {}]   ;;  %s1006_s8 = inlined_call_operand.vmem [shape: f32[32,1], index: 8, kind: input, shape index: {}]   ;;  %s1007_s11 = inlined_call_operand.vmem [shape: f32[32,1], index: 11, kind: input, shape index: {}]   ;;  %s1008_s10 = inlined_call_operand.vmem [shape: f32[8,1], index: 10, kind: input, shape index: {}]   ;;  %s1009_s7 = inlined_call_operand.vmem [shape: f32[32,32], index: 7, kind: input, shape index: {}]   ;;  %s1010_s1 = inlined_call_operand.vmem [shape: f32[12,128], index: 1, kind: input, shape index: {}]   ;;  %s1011_s13 = inlined_call_operand.vmem [shape: f32[1,128], index: 13, kind: output, shape index: {}]  }
   0x1   :  { %v742_v1 = vld [vmem:[%s998_s0] sm:$0xff]  ;;  %v747_v2 = vld [vmem:[%s998_s0 + $0x8] sm:$0xff]  ;;  %v752_v3 = vld [vmem:[%s998_s0 + $0x10] sm:$0xff]  ;;  %662 = vset.pattern.permute.xlu1 %v667_v4  ;;  %661 = vset.pattern.permute.xlu0 %v667_v4  ;;  %v178_v6 = vunpack.c.l.s4 %v668_v5  ;;  %v18_v7 = vstv %s999_s2  ;;  %vm72_vm1 = vcmask 1043456  }
   0x2   :  { %v760_v8 = vld [vmem:[%s998_s0 + $0x18] sm:$0xff]  ;;  %v765_v9 = vld [vmem:[%s998_s0 + $0x20] sm:$0xff]  ;;  %v770_v10 = vld [vmem:[%s998_s0 + $0x28] sm:$0xff]  ;;  %v62_v11 = vadd.f32 %v747_v2, %v742_v1  ;;  %v88_v12 = vshrl.u32 %v87_v0, 7  ;;  %19 = vst [vmem:[#allocation2] sm:$0x1] %v18_v7  ;;  %v20_v13 = vstv %s1000_s9  ;;  %v135_v59 = vmul.f32 %v742_v1, %v742_v1 }
   0x3   :  { %v64_v14 = vadd.f32 %v765_v9, %v760_v8  ;;  %v782_v15 = vld [vmem:[%s998_s0 + $0x30] sm:$0xff]  ;;  %v787_v16 = vld [vmem:[%s998_s0 + $0x38] sm:$0xff]  ;;  %v792_v17 = vld [vmem:[%s998_s0 + $0x40] sm:$0xff]  ;;  %v179_v18 = vunpack.c.0.s8 %v178_v6  ;;  %21 = vst [vmem:[#allocation3] sm:$0x1] %v20_v13  ;;  %v22_v19 = vstv %s1001_s12  ;;  %v138_v53 = vmul.f32 %v760_v8, %v760_v8 }
   0x4   :  { %v798_v20 = vadd.f32 %v62_v11, %v752_v3  ;;  %v803_v21 = vld [vmem:[%s998_s0 + $0x48] sm:$0xff]  ;;  %v808_v22 = vld [vmem:[%s998_s0 + $0x50] sm:$0xff]  ;;  %v813_v23 = vld [vmem:[%s998_s0 + $0x58] sm:$0xff]  ;;  %v66_v24 = vadd.f32 %v787_v16, %v782_v15  ;;  %23 = vst [vmem:[#allocation4] sm:$0x1] %v22_v19  ;;  %v846_v36 = vsub.s32 0, %v88_v12  ;;  %v139_v54 = vmul.f32 %v765_v9, %v765_v9 }
   0x5   :  { %v818_v25 = vadd.f32 %v64_v14, %v770_v10  ;;  %v68_v26 = vadd.f32 %v808_v22, %v803_v21  ;;  %v233_v27 = vld [vmem:[%s1002_s5] sm:$0xff]  ;;  %v239_v29 = vld [vmem:[%s1003_s6 + $0x10] sm:$0xff]  ;;  %v182_v31 = vsub.s32 %v179_v18, %v88_v12  ;;  %v240_v35 = vld [vmem:[%s1003_s6 + $0x18] sm:$0xff]  ;;  %v140_v57 = vmul.f32 %v770_v10, %v770_v10 }
   0x6   :  { %v826_v28 = vadd.f32 %v66_v24, %v792_v17  ;;  %611 = vmatprep.mubr.msk.f32.mxu0 %vm261_vm0, %v233_v27  ;;  %v237_v30 = vld [vmem:[%s1003_s6] sm:$0xff]  ;;  %253 = vperm.xlu1 %662, %v239_v29   ;;  %v238_v40 = vld [vmem:[%s1003_s6 + $0x8] sm:$0xff]  ;;  %v235_v55 = vld [vmem:[%s1002_s5 + $0x10] sm:$0xff]  ;;  %v149_v61 = vadd.f32 %v139_v54, %v138_v53  ;;  %v136_v62 = vmul.f32 %v747_v2, %v747_v2 }
   0x7   :  { %v631_v32 = vpack.c.bf16 %v818_v25, %v798_v20  ;;  %v838_v33 = vadd.f32 %v68_v26, %v813_v23  ;;  %243 = vperm.xlu0 %661, %v237_v30   ;;  %v577_v34 = vld.sshfl [vmem:[%s1004_s4] sm:$0x33 pattern:$0x75316420]  ;;  %v234_v50 = vld [vmem:[%s1002_s5 + $0x8] sm:$0xff]  ;;  %v873_v58 = vmul.f32 %v818_v25, %v818_v25  ;;  %v137_v63 = vmul.f32 %v752_v3, %v752_v3  ;;  %v236_v4 = vld [vmem:[%s1002_s5 + $0x18] sm:$0xff] }
   0x8   :  { %v176_v37 = vcombine.high %v577_v34, %v577_v34  ;;  %v183_v38 = vrot.slane %v577_v34, %v182_v31  ;;  %v92_v45 = vld [vmem:[%s1005_s3] sm:$0x3f]  ;;  %v888_v1 = vmul.f32 %v798_v20, %v798_v20  ;;  %v894_v2 = vadd.f32 %v149_v61, %v140_v57  ;;  %v368_v12 = vld [vmem:[%s1006_s8 + $0x8] sm:$0xff]  ;;  %v370_v26 = vld [vmem:[%s1006_s8 + $0x18] sm:$0xff] }
   0x9   :  { %632 = vmatprep.subr.bf16.mxu0 %v631_v32  ;;  %v635_v39 = vpack.c.bf16 %v838_v33, %v826_v28  ;;  %647 = vpush %v92_v45  ;;  %v101_v47 = vrot.slane %v92_v45, 1  ;;  %v108_v48 = vrot.slane %v92_v45, 2  ;;  %v115_v49 = vrot.slane %v92_v45, 3  ;;  %v367_v60 = vld [vmem:[%s1006_s8] sm:$0xff] }
   0xa   :  { %634 = vmatpush3.bf16.msra.mxu0 %v631_v32  ;;  %v190_v41 = vrot.slane %v176_v37, %v182_v31  ;;  %v191_v42 = vcombine.high %v183_v38, %v183_v38  ;;  %258 = vperm.xlu1 %662, %v240_v35   ;;  %v196_v44 = vrot.slane %v183_v38, %v846_v36  ;;  %v122_v52 = vrot.slane %v92_v45, 4  ;;  %v518_v32 = vld [vmem:[%s1007_s11 + $0x8] sm:$0xff]  ;;  %v517_v34 = vld [vmem:[%s1007_s11] sm:$0xff]  ;;  %v520_v37 = vld [vmem:[%s1007_s11 + $0x18] sm:$0xff] }
   0xb   :  { %636 = vmatprep.subr.bf16.mxu0 %v635_v39  ;;  %248 = vperm.xlu0 %661, %v238_v40   ;;  %649 = vpush %v101_v47  ;;  %v129_v56 = vrot.slane %v92_v45, 5  ;;  %v147_v5 = vadd.f32 %v136_v62, %v135_v59  ;;  %v93_v3 = vmul.f32 %v818_v25, %v798_v20  ;;  %v555_v38 = vld [vmem:[#allocation4] sm:$0x1] }
   0xc   :  { %v200_v43 = vrot.slane %v190_v41, %v846_v36  ;;  %v192_v46 = vcombine.high %v190_v41, %v190_v41  ;;  %v204_v51 = vrot.slane %v191_v42, %v846_v36  ;;  %651 = vpush %v108_v48  ;;  %v100_v6 = vmul.f32 %v826_v28, %v798_v20  ;;  %v363_v57 = vld [vmem:[%s1009_s7] sm:$0xff] }
   0xd   :  { %653 = vpush %v115_v49  ;;  %v141_v7 = vmul.f32 %v782_v15, %v782_v15  ;;  %v142_v8 = vmul.f32 %v787_v16, %v787_v16  ;;  %v160_v9 = vsub.f32 %v873_v58, %v894_v2  ;;  %v906_v10 = vadd.f32 %v147_v5, %v137_v63 }
   0xe   :  { %638 = vmatpush3.bf16.msra.mxu0 %v635_v39  ;;  %214 = vperm.xlu1 %662, %v200_v43   ;;  %v208_v0 = vrot.slane %v192_v46, %v846_v36  ;;  %655 = vpush %v122_v52  ;;  %v143_v11 = vmul.f32 %v792_v17, %v792_v17  ;;  %v492_v39 = vld [vmem:[#allocation3] sm:$0x1] }
   0xf   :  { %210 = vperm.xlu0 %661, %v196_v44   ;;  %657 = vpush %v129_v56  ;;  %v151_v13 = vadd.f32 %v142_v8, %v141_v7  ;;  %v916_v14 = vmul.f32 %v826_v28, %v826_v28  ;;  %v159_v15 = vsub.f32 %v888_v1, %v906_v10  ;;  %v164_v63 = vmul.f32 0.5, %v160_v9 }
  0x10   :  { %v107_v16 = vmul.f32 %v838_v33, %v798_v20  ;;  %v144_v17 = vmul.f32 %v803_v21, %v803_v21  ;;  %v145_v19 = vmul.f32 %v808_v22, %v808_v22  ;;  %v146_v24 = vmul.f32 %v813_v23, %v813_v23  ;;  %v369_v21 = vld [vmem:[%s1006_s8 + $0x10] sm:$0xff]  ;;  %625 = vmatprep.mubr.msk.f32.mxu1 %vm261_vm0, %v363_v57 }
  0x11   :  { %612 = vmatmul.mubr.msk.f32.vlgmr.msra.gmra.mrb[0].mxu0 %vm261_vm0, %v234_v50  ;;  %v924_v18 = vadd.f32 %v151_v13, %v143_v11  ;;  %v935_v20 = vmul.f32 %v838_v33, %v838_v33  ;;  %v114_v23 = vmul.f32 %v826_v28, %v818_v25  ;;  %v121_v29 = vmul.f32 %v838_v33, %v818_v25  ;;  %v503_v25 = vld [vmem:[%s1008_s10] sm:$0xff] }
  0x12   :  { %614 = vmatprep.mubr.msk.f32.mxu0 %vm261_vm0, %v235_v55  ;;  %373 = vperm.xlu1 %662, %v367_v60   ;;  %v153_v22 = vadd.f32 %v145_v19, %v144_v17  ;;  %v128_v30 = vmul.f32 %v838_v33, %v826_v28  ;;  %v519_v28 = vld [vmem:[%s1007_s11 + $0x10] sm:$0xff]  ;;  %v81_v33 = vld [vmem:[#allocation2] sm:$0x1] }
  0x13   :  { %218 = vperm.xlu0 %661, %v204_v51   ;;  %v161_v27 = vsub.f32 %v916_v14, %v924_v18 }
  0x14   :  { %v154_v31 = vadd.f32 %v153_v22, %v146_v24 }
  0x15   :  { %615 = vmatmul.mubr.msk.f32.gmra.mrb[2].mxu0 %vm261_vm0, %v236_v4  ;;  %v165_v7 = vmul.f32 0.5, %v161_v27 }
  0x16   :  { %222 = vperm.xlu1 %662, %v208_v0   ;;  %v162_v35 = vsub.f32 %v935_v20, %v154_v31  ;;  %v163_v0 = vmul.f32 0.5, %v159_v15  ;;  %v364_v31 = vld [vmem:[%s1009_s7 + $0x8] sm:$0xff] }
  0x17   :  { %378 = vperm.xlu0 %661, %v368_v12  }
  0x18   :  { %v166_v13 = vmul.f32 0.5, %v162_v35 }
  0x1a   :  { %388 = vperm.xlu1 %662, %v370_v26  }
  0x1b   :  { %383 = vperm.xlu0 %661, %v369_v21  }
  0x1e   :  { %528 = vperm.xlu1 %662, %v518_v32   ;;  %v365_v32 = vld [vmem:[%s1009_s7 + $0x10] sm:$0xff] }
  0x1f   :  { %523 = vperm.xlu0 %661, %v517_v34   ;;  %v366_v34 = vld [vmem:[%s1009_s7 + $0x18] sm:$0xff] }
  0x22   :  { %506 = vperm.xlu1 %662, %v503_v25   ;;  %v71_v25 = vld [vmem:[%s1010_s1 + $0x8] sm:$0xf] }
  0x23   :  { %533 = vperm.xlu0 %661, %v519_v28  }
  0x26   :  { %84 = vperm.xlu1 %662, %v81_v33   ;;  %v70_v33 = vld [vmem:[%s1010_s1] sm:$0xff] }
  0x27   :  { %538 = vperm.xlu0 %661, %v520_v37   ;;  %v73_v37 = vsel %vm72_vm1, %v71_v25, 0.0 }
  0x2a   :  { %558 = vperm.xlu1 %662, %v555_v38  }
  0x2b   :  { %495 = vperm.xlu0 %661, %v492_v39   ;;  %v74_v39 = vadd.f32 %v73_v37, %v70_v33 }
  0x3a   :  { %s648_s4 = spop %647 }
  0x3b   :  { %v96_v40 = vstv %s648_s4 }
  0x3c   :  { %v98_v41 = vmul.f32 %v96_v40, %v93_v3  ;;  %s650_s10 = spop %649 }
  0x3d   :  { %v103_v42 = vstv %s650_s10  ;;  %s652_s28 = spop %651 }
  0x3e   :  { %v105_v43 = vmul.f32 %v103_v42, %v100_v6  ;;  %v110_v44 = vstv %s652_s28  ;;  %s654_s6 = spop %653 }
  0x3f   :  { %v112_v45 = vmul.f32 %v110_v44, %v107_v16  ;;  %v117_v46 = vstv %s654_s6  ;;  %s656_s9 = spop %655 }
  0x40   :  { %v106_v47 = vadd.f32 %v105_v43, %v98_v41  ;;  %v119_v48 = vmul.f32 %v117_v46, %v114_v23  ;;  %v124_v49 = vstv %s656_s9  ;;  %s658_s11 = spop %657  ;;  %v75_v41 = vrot.slane %v74_v39, 4 }
  0x41   :  { %v131_v50 = vstv %s658_s11  ;;  %v126_v52 = vmul.f32 %v124_v49, %v121_v29 }
  0x42   :  { %v113_v51 = vadd.f32 %v112_v45, %v106_v47  ;;  %v133_v54 = vmul.f32 %v131_v50, %v128_v30  ;;  %v76_v45 = vadd.f32 %v75_v41, %v74_v39 }
  0x44   :  { %v120_v53 = vadd.f32 %v119_v48, %v113_v51  ;;  %v77_v50 = vrot.slane %v76_v45, 2 }
  0x46   :  { %v127_v55 = vadd.f32 %v126_v52, %v120_v53 }
  0x48   :  { %v134_v56 = vadd.f32 %v133_v54, %v127_v55 }
  0x85   :  { %v254_v59 = vpop.permute.xlu1 %253 }
  0x86   :  { %v244_v60 = vpop.permute.xlu0 %243 }
  0x89   :  { %v259_v61 = vpop.permute.xlu1 %258 }
  0x8a   :  { %v249_v62 = vpop.permute.xlu0 %248 }
  0x8d   :  { %v215_v4 = vpop.permute.xlu1 %214 }
  0x8e   :  { %v226_v5 = vmul.f32 %v215_v4, %v164_v63  ;;  %v211_v3 = vpop.permute.xlu0 %210 }
  0x8f   :  { %v225_v6 = vmul.f32 %v211_v3, %v163_v0 }
  0x91   :  { %v229_v8 = vadd.f32 %v226_v5, %v225_v6  ;;  %v374_v11 = vpop.permute.xlu1 %373 }
  0x92   :  { %v219_v12 = vpop.permute.xlu0 %218 }
  0x93   :  { %v227_v14 = vmul.f32 %v219_v12, %v165_v7 }
  0x95   :  { %v230_v16 = vadd.f32 %v229_v8, %v227_v14  ;;  %v223_v17 = vpop.permute.xlu1 %222 }
  0x96   :  { %v228_v18 = vmul.f32 %v223_v17, %v166_v13  ;;  %v379_v28 = vpop.permute.xlu0 %378 }
  0x98   :  { %v231_v19 = vadd.f32 %v230_v16, %v228_v18 }
  0x99   :  { %v389_v35 = vpop.permute.xlu1 %388 }
  0x9a   :  { %v232_v58 = vadd.f32 %v231_v19, %v134_v56  ;;  %v384_v40 = vpop.permute.xlu0 %383 }
  0x9d   :  { %v529_v38 = vpop.permute.xlu1 %528 }
  0x9e   :  { %v524_v43 = vpop.permute.xlu0 %523 }
  0xa1   :  { %v507_v42 = vpop.permute.xlu1 %506 }
  0xa2   :  { %v509_v44 = vmul.f32 %v507_v42, %v232_v58  ;;  %v534_v52 = vpop.permute.xlu0 %533 }
  0xa4   :  { %v510_v49 = vrot.slane %v509_v44, 4 }
  0xa5   :  { %v85_v12 = vpop.permute.xlu1 %84 }
  0xa6   :  { %v539_v3 = vpop.permute.xlu0 %538  ;;  %v90_v17 = vrot.slane %v85_v12, %v846_v36 }
  0xaa   :  { %v496_v19 = vpop.permute.xlu0 %495 }
  0xe4   :  { %v613_v2 = vpop.f32.mrb[0].mxu0 }
  0xe5   :  { %v346_v9 = vadd.f32 %v613_v2, %v249_v62  ;;  %v340_v24 = vpop.f32.mrb[1].mxu0 }
  0xe6   :  { %v341_v1 = vadd.f32 %v340_v24, %v244_v60  ;;  %v511_v60 = vadd.f32 %v510_v49, %v509_v44  ;;  %v501_v24 = vrot.slane %v496_v19, %v846_v36 }
  0xe7   :  { %v360_v10 = vmax.f32 %v346_v9, 0.0 }
  0xe8   :  { %v359_v15 = vmax.f32 %v341_v1, 0.0  ;;  %v616_v26 = vpop.f32.mrb[2].mxu0  ;;  %v512_v6 = vrot.slane %v511_v60, 2 }
  0xe9   :  { %v356_v20 = vadd.f32 %v616_v26, %v259_v61  ;;  %v350_v21 = vpop.f32.mrb[3].mxu0  ;;  %v78_v61 = vadd.f32 %v77_v50, %v76_v45 }
  0xea   :  { %v351_v27 = vadd.f32 %v350_v21, %v254_v59  ;;  %v639_v22 = vpack.c.bf16 %v360_v10, %v359_v15  ;;  %v513_v14 = vadd.f32 %v512_v6, %v511_v60 }
  0xeb   :  { %v362_v23 = vmax.f32 %v356_v20, 0.0  ;;  %v79_v7 = vrot.slane %v78_v61, 1 }
  0xec   :  { %v361_v29 = vmax.f32 %v351_v27, 0.0  ;;  %640 = vmatprep.subr.bf16.mxu1 %v639_v22  ;;  %v514_v2 = vrot.slane %v513_v14, 1  ;;  %v559_v27 = vpop.permute.xlu1 %558 }
  0xed   :  { %642 = vmatpush3.bf16.msra.mxu1 %v639_v22  ;;  %v80_v16 = vadd.f32 %v79_v7, %v78_v61 }
  0xee   :  { %v643_v30 = vpack.c.bf16 %v362_v23, %v361_v29  ;;  %v515_v26 = vadd.f32 %v514_v2, %v513_v14  ;;  %v564_v29 = vrot.slane %v559_v27, %v846_v36 }
  0xef   :  { %v91_v9 = vadd.f32 %v90_v17, %v80_v16 }
  0xf0   :  { %644 = vmatprep.subr.bf16.mxu1 %v643_v30 }
  0xf1   :  { %646 = vmatpush3.bf16.msra.mxu1 %v643_v30  ;;  %v502_v15 = vmul.f32 %v501_v24, %v91_v9 }
  0xf3   :  { %v516_v22 = vadd.f32 %v515_v26, %v502_v15 }
  0xf4   :  { %626 = vmatmul.mubr.msk.f32.vlgmr.msra.gmra.mrb[0].mxu1 %vm261_vm0, %v364_v31 }
  0xf5   :  { %628 = vmatprep.mubr.msk.f32.mxu1 %vm261_vm0, %v365_v32 }
  0xf8   :  { %629 = vmatmul.mubr.msk.f32.gmra.mrb[2].mxu1 %vm261_vm0, %v366_v34 }
 0x1c7   :  { %v627_v46 = vpop.f32.mrb[0].mxu1 }
 0x1c8   :  { %v475_v47 = vadd.f32 %v627_v46, %v379_v28  ;;  %v469_v48 = vpop.f32.mrb[1].mxu1 }
 0x1c9   :  { %v470_v51 = vadd.f32 %v469_v48, %v374_v11 }
 0x1ca   :  { %v489_v53 = vmax.f32 %v475_v47, 0.0 }
 0x1cb   :  { %v488_v54 = vmax.f32 %v470_v51, 0.0  ;;  %v630_v55 = vpop.f32.mrb[2].mxu1 }
 0x1cc   :  { %v542_v56 = vmul.f32 %v529_v38, %v489_v53  ;;  %v485_v57 = vadd.f32 %v630_v55, %v389_v35  ;;  %v479_v59 = vpop.f32.mrb[3].mxu1 }
 0x1cd   :  { %v541_v62 = vmul.f32 %v524_v43, %v488_v54  ;;  %v480_v63 = vadd.f32 %v479_v59, %v384_v40 }
 0x1ce   :  { %v491_v4 = vmax.f32 %v485_v57, 0.0 }
 0x1cf   :  { %v545_v0 = vadd.f32 %v542_v56, %v541_v62  ;;  %v490_v5 = vmax.f32 %v480_v63, 0.0 }
 0x1d0   :  { %v544_v11 = vmul.f32 %v539_v3, %v491_v4 }
 0x1d1   :  { %v543_v8 = vmul.f32 %v534_v52, %v490_v5 }
 0x1d3   :  { %v546_v13 = vadd.f32 %v545_v0, %v543_v8 }
 0x1d5   :  { %v547_v18 = vadd.f32 %v546_v13, %v544_v11 }
 0x1d7   :  { %v548_v58 = vrot.slane %v547_v18, 4 }
 0x1d9   :  { %v549_v1 = vadd.f32 %v548_v58, %v547_v18 }
 0x1db   :  { %v550_v10 = vrot.slane %v549_v1, 2 }
 0x1dd   :  { %v551_v20 = vadd.f32 %v550_v10, %v549_v1 }
 0x1df   :  { %v552_v21 = vrot.slane %v551_v20, 1 }
 0x1e1   :  { %v553_v23 = vadd.f32 %v552_v21, %v551_v20 }
 0x1e3   :  { %v554_v30 = vadd.f32 %v553_v23, %v516_v22 }
 0x1e5   :  { %v565_v31 = vadd.f32 %v564_v29, %v554_v30 }
 0x1e7   :  { %v586_v32 = vmul.f32 -1.442695, %v565_v31 }
 0x1e9   :  { %663 = vpow2.f32 %v586_v32 }
 0x1f3   :  { %v664_v34 = vpop.eup %663 }
 0x1f4   :  { %v569_v35 = vadd.f32 1.0, %v664_v34 }
 0x1f6   :  { %665 = vrcp.f32 %v569_v35 }
 0x200   :  { %v666_v25 = vpop.eup %665 }
 0x201   :  { %572 = vst [vmem:[%s1011_s13] sm:$0x1] %v666_v25 }

</bundles_post_ra>
